<compile_context>
chip_gen: v5e
topology: v5e:2x2
jax: 0.10.0
libtpu: 0.0.40
codegen_flags: <defaults>
</compile_context>

<pallas_src>
import functools

import jax
import jax.numpy as jnp
from jax.experimental import pallas as pl
from jax.experimental.pallas import tpu as pltpu

EPS = 1e-5          # PyTorch BatchNorm1d default eps
NEG_INF = -1e30     # bias for padded softmax lanes -> exp(...) == 0 exactly


def _round_up(x, m):
    return (x + m - 1) // m * m


def _make_critic_kernel(state_size, action_size, fc1, fc2, atoms_pad):
    """Build the single-program kernel; all sizes are static (closed over)."""

    def kernel(state_ref, action_ref, vec_ref, w1_ref, w2s_ref, w3_ref, out_ref):
        state = state_ref[...]          # (B, state_size) f32
        action = action_ref[...]        # (B, action_size) f32

        # --- packed small vectors, static lane slices ------------------------
        g0 = vec_ref[0:1, :state_size]
        b0 = vec_ref[1:2, :state_size]
        g1 = vec_ref[2:3, :fc1]
        bbn1 = vec_ref[3:4, :fc1]
        bias2 = vec_ref[4:5, :fc2]
        bias3 = vec_ref[5:6, :atoms_pad]            # padded lanes hold -1e30
        w2a = vec_ref[6:6 + action_size, :fc2]      # (action_size, fc2) f32

        # --- bn0: batch statistics, pre-folded affine scale -------------------
        mu0 = jnp.mean(state, axis=0, keepdims=True)
        var0 = jnp.mean((state - mu0) ** 2, axis=0, keepdims=True)
        s0 = g0 * jax.lax.rsqrt(var0 + EPS)          # (1, state_size)
        x = (state - mu0) * s0 + b0

        # --- fc1 (bias omitted: cancels in bn1) -> bn1 -> relu ----------------
        h1 = jnp.dot(x.astype(jnp.bfloat16), w1_ref[...],
                     preferred_element_type=jnp.float32)
        mu1 = jnp.mean(h1, axis=0, keepdims=True)
        var1 = jnp.mean((h1 - mu1) ** 2, axis=0, keepdims=True)
        s1 = g1 * jax.lax.rsqrt(var1 + EPS)          # (1, fc1)
        h1 = jnp.maximum((h1 - mu1) * s1 + bbn1, 0.0)

        # --- cat([h1, action]) @ W2^T ------------------------------------------
        # h1 part on the MXU; tiny K=action_size part as VPU broadcast FMAs.
        h2 = jnp.dot(h1.astype(jnp.bfloat16), w2s_ref[...],
                     preferred_element_type=jnp.float32) + bias2
        for k in range(action_size):                 # unrolled, A == 4
            h2 = h2 + action[:, k:k + 1] * w2a[k:k + 1, :]
        h2 = jnp.maximum(h2, 0.0)

        # --- fc3 -> softmax over (padded) atoms --------------------------------
        logits = jnp.dot(h2.astype(jnp.bfloat16), w3_ref[...],
                         preferred_element_type=jnp.float32) + bias3
        m = jnp.max(logits, axis=-1, keepdims=True)
        e = jnp.exp(logits - m)
        denom = jnp.sum(e, axis=-1, keepdims=True)
        out_ref[...] = e * pl.reciprocal(denom, approx=True)

    return kernel


def critic_forward(state, action, packed, *, num_atoms):
    """Single-program pallas_call; everything fits easily in VMEM (<1 MiB)."""
    batch, state_size = state.shape
    action_size = action.shape[1]
    fc1 = packed["w1"].shape[1]
    fc2 = packed["w2s"].shape[1]
    atoms_pad = packed["w3"].shape[1]

    kernel = _make_critic_kernel(state_size, action_size, fc1, fc2, atoms_pad)
    vmem = pl.BlockSpec(memory_space=pltpu.MemorySpace.VMEM)

    out_padded = pl.pallas_call(
        kernel,
        out_shape=jax.ShapeDtypeStruct((batch, atoms_pad), jnp.float32),
        in_specs=[vmem] * 6,
        out_specs=vmem,
    )(state, action, packed["vecs"], packed["w1"], packed["w2s"], packed["w3"])

    return out_padded[:, :num_atoms]


def init_params(key, state_size, action_size, num_atoms,
                fc1_units=256, fc2_units=128):
    """Synthetic init mirroring the PyTorch reset_parameters ranges.

    Weights are kept pre-transposed as (in_features, out_features).
    fc1's Linear bias is intentionally omitted: it cancels exactly under the
    immediately following BatchNorm's batch-mean subtraction.
    """
    ks = jax.random.split(key, 4)
    u = jax.random.uniform

    lim1 = 1.0 / float(fc1_units) ** 0.5             # hidden_init: fan_in = out dim
    lim2 = 1.0 / float(fc2_units) ** 0.5
    blim2 = 1.0 / float(fc1_units + action_size) ** 0.5
    blim3 = 1.0 / float(fc2_units) ** 0.5

    w2_full = u(ks[1], (fc1_units + action_size, fc2_units),
                minval=-lim2, maxval=lim2, dtype=jnp.float32)

    return {
        "g0": jnp.ones((state_size,), jnp.float32),
        "b0": jnp.zeros((state_size,), jnp.float32),
        "g1": jnp.ones((fc1_units,), jnp.float32),
        "bbn1": jnp.zeros((fc1_units,), jnp.float32),
        "w1": u(ks[0], (state_size, fc1_units), minval=-lim1, maxval=lim1,
                dtype=jnp.float32),
        "w2s": w2_full[:fc1_units, :],
        "w2a": w2_full[fc1_units:, :],
        "bias2": u(ks[2], (fc2_units,), minval=-blim2, maxval=blim2,
                   dtype=jnp.float32),
        "w3": u(ks[3], (fc2_units, num_atoms), minval=-0.003, maxval=0.003,
                dtype=jnp.float32),
        "bias3": u(ks[3], (num_atoms,), minval=-blim3, maxval=blim3,
                   dtype=jnp.float32),
    }


def pack_params(params, state_size, action_size, num_atoms,
                fc1_units=256, fc2_units=128):
    """Coalesce the many tiny (F,) vectors (and the action slice of W2) into a
    single VMEM-friendly array, pad atoms to a 128-lane multiple, and cast the
    MXU weights to bf16."""
    atoms_pad = _round_up(max(num_atoms, 128), 128)
    vec_w = max(state_size, fc1_units, fc2_units, atoms_pad)
    n_rows = 6 + action_size

    vecs = jnp.zeros((n_rows, vec_w), jnp.float32)
    vecs = vecs.at[0, :state_size].set(params["g0"])
    vecs = vecs.at[1, :state_size].set(params["b0"])
    vecs = vecs.at[2, :fc1_units].set(params["g1"])
    vecs = vecs.at[3, :fc1_units].set(params["bbn1"])
    vecs = vecs.at[4, :fc2_units].set(params["bias2"])
    bias3_pad = jnp.full((atoms_pad,), NEG_INF, jnp.float32)
    bias3_pad = bias3_pad.at[:num_atoms].set(params["bias3"])
    vecs = vecs.at[5, :atoms_pad].set(bias3_pad)
    vecs = vecs.at[6:6 + action_size, :fc2_units].set(params["w2a"])

    w3_pad = jnp.zeros((fc2_units, atoms_pad), jnp.float32)
    w3_pad = w3_pad.at[:, :num_atoms].set(params["w3"])

    return {
        "vecs": vecs,
        "w1": params["w1"].astype(jnp.bfloat16),
        "w2s": params["w2s"].astype(jnp.bfloat16),
        "w3": w3_pad.astype(jnp.bfloat16),
    }


def critic_reference(state, action, params):
    """Pure-JAX reference (same bf16-weight matmuls, exact divide in softmax)."""
    mu0 = state.mean(0, keepdims=True)
    var0 = ((state - mu0) ** 2).mean(0, keepdims=True)
    x = (state - mu0) * (params["g0"] * jax.lax.rsqrt(var0 + EPS)) + params["b0"]

    h1 = jnp.dot(x.astype(jnp.bfloat16), params["w1"].astype(jnp.bfloat16),
                 preferred_element_type=jnp.float32)
    mu1 = h1.mean(0, keepdims=True)
    var1 = ((h1 - mu1) ** 2).mean(0, keepdims=True)
    h1 = jnp.maximum(
        (h1 - mu1) * (params["g1"] * jax.lax.rsqrt(var1 + EPS)) + params["bbn1"], 0.0)

    h2 = jnp.dot(h1.astype(jnp.bfloat16), params["w2s"].astype(jnp.bfloat16),
                 preferred_element_type=jnp.float32)
    h2 = jnp.maximum(h2 + action @ params["w2a"] + params["bias2"], 0.0)

    logits = jnp.dot(h2.astype(jnp.bfloat16), params["w3"].astype(jnp.bfloat16),
                     preferred_element_type=jnp.float32) + params["bias3"]
    return jax.nn.softmax(logits, axis=-1)


if __name__ == "__main__":
    # Small shapes consistent with the module (Reacher-like critic).
    BATCH = 8                 # multiple of 8 -> full sublane tiles
    STATE_SIZE = 16
    ACTION_SIZE = 4
    NUM_ATOMS = 32
    FC1, FC2 = 256, 128

    key = jax.random.PRNGKey(0)
    k_state, k_action, k_params = jax.random.split(key, 3)

    state = jax.random.normal(k_state, (BATCH, STATE_SIZE), dtype=jnp.float32)
    action = jax.random.uniform(k_action, (BATCH, ACTION_SIZE),
                                minval=-1.0, maxval=1.0, dtype=jnp.float32)

    params = init_params(k_params, STATE_SIZE, ACTION_SIZE, NUM_ATOMS, FC1, FC2)
    packed = pack_params(params, STATE_SIZE, ACTION_SIZE, NUM_ATOMS, FC1, FC2)

    forward = jax.jit(functools.partial(critic_forward, num_atoms=NUM_ATOMS))
    out = jax.block_until_ready(forward(state, action, packed))

    assert out.shape == (BATCH, NUM_ATOMS)
    # softmax rows must sum to ~1 (approx-reciprocal epilogue -> loose tol)
    assert bool(jnp.all(jnp.abs(jnp.sum(out, axis=-1) - 1.0) < 5e-3))
    # match the pure-JAX reference
    ref = jax.block_until_ready(critic_reference(state, action, params))
    assert bool(jnp.max(jnp.abs(out - ref)) < 1e-2)

    print("KERNEL_OK")
</pallas_src>

<mosaic_0001>
module attributes {stable_mosaic.version = 11 : i64} {
  func.func @kernel(%arg0: memref<8x16xf32, #tpu.memory_space<vmem>>, %arg1: memref<8x4xf32, #tpu.memory_space<vmem>>, %arg2: memref<10x256xf32, #tpu.memory_space<vmem>>, %arg3: memref<16x256xbf16, #tpu.memory_space<vmem>>, %arg4: memref<256x128xbf16, #tpu.memory_space<vmem>>, %arg5: memref<128x128xbf16, #tpu.memory_space<vmem>>, %arg6: memref<8x128xf32, #tpu.memory_space<vmem>>) attributes {dimension_semantics = [], scalar_prefetch = 0 : i64, scratch_operands = 0 : i64, tpu.core_type = #tpu.core_type<tc>} {
    %c0 = arith.constant 0 : index
    %c0_0 = arith.constant 0 : index
    %0 = vector.load %arg0[%c0, %c0_0] : memref<8x16xf32, #tpu.memory_space<vmem>>, vector<8x16xf32>
    %c0_1 = arith.constant 0 : index
    %c0_2 = arith.constant 0 : index
    %1 = vector.load %arg1[%c0_1, %c0_2] : memref<8x4xf32, #tpu.memory_space<vmem>>, vector<8x4xf32>
    %c0_3 = arith.constant 0 : index
    %c0_4 = arith.constant 0 : index
    %2 = vector.load %arg2[%c0_3, %c0_4] : memref<10x256xf32, #tpu.memory_space<vmem>>, vector<1x16xf32>
    %c1 = arith.constant 1 : index
    %c0_5 = arith.constant 0 : index
    %3 = vector.load %arg2[%c1, %c0_5] : memref<10x256xf32, #tpu.memory_space<vmem>>, vector<1x16xf32>
    %c2 = arith.constant 2 : index
    %c0_6 = arith.constant 0 : index
    %4 = vector.load %arg2[%c2, %c0_6] : memref<10x256xf32, #tpu.memory_space<vmem>>, vector<1x256xf32>
    %c3 = arith.constant 3 : index
    %c0_7 = arith.constant 0 : index
    %5 = vector.load %arg2[%c3, %c0_7] : memref<10x256xf32, #tpu.memory_space<vmem>>, vector<1x256xf32>
    %c4 = arith.constant 4 : index
    %c0_8 = arith.constant 0 : index
    %6 = vector.load %arg2[%c4, %c0_8] : memref<10x256xf32, #tpu.memory_space<vmem>>, vector<1x128xf32>
    %c5 = arith.constant 5 : index
    %c0_9 = arith.constant 0 : index
    %7 = vector.load %arg2[%c5, %c0_9] : memref<10x256xf32, #tpu.memory_space<vmem>>, vector<1x128xf32>
    %c6 = arith.constant 6 : index
    %c0_10 = arith.constant 0 : index
    %8 = vector.load %arg2[%c6, %c0_10] : memref<10x256xf32, #tpu.memory_space<vmem>>, vector<4x128xf32>
    %cst = arith.constant dense<0.000000e+00> : vector<16xf32>
    %9 = vector.multi_reduction <add>, %0, %cst [0] : vector<8x16xf32> to vector<16xf32>
    %10 = vector.shape_cast %9 : vector<16xf32> to vector<1x16xf32>
    %cst_11 = arith.constant 8.000000e+00 : f32
    %11 = vector.broadcast %cst_11 : f32 to vector<1x16xf32>
    %12 = arith.divf %10, %11 : vector<1x16xf32>
    %13 = vector.broadcast %12 : vector<1x16xf32> to vector<8x16xf32>
    %14 = arith.subf %0, %13 : vector<8x16xf32>
    %15 = arith.mulf %14, %14 : vector<8x16xf32>
    %cst_12 = arith.constant dense<0.000000e+00> : vector<16xf32>
    %16 = vector.multi_reduction <add>, %15, %cst_12 [0] : vector<8x16xf32> to vector<16xf32>
    %17 = vector.shape_cast %16 : vector<16xf32> to vector<1x16xf32>
    %cst_13 = arith.constant 8.000000e+00 : f32
    %18 = vector.broadcast %cst_13 : f32 to vector<1x16xf32>
    %19 = arith.divf %17, %18 : vector<1x16xf32>
    %cst_14 = arith.constant 9.99999974E-6 : f32
    %20 = vector.broadcast %cst_14 : f32 to vector<1x16xf32>
    %21 = arith.addf %19, %20 : vector<1x16xf32>
    %22 = math.rsqrt %21 : vector<1x16xf32>
    %23 = arith.mulf %2, %22 : vector<1x16xf32>
    %24 = vector.broadcast %12 : vector<1x16xf32> to vector<8x16xf32>
    %25 = arith.subf %0, %24 : vector<8x16xf32>
    %26 = vector.broadcast %23 : vector<1x16xf32> to vector<8x16xf32>
    %27 = arith.mulf %25, %26 : vector<8x16xf32>
    %28 = vector.broadcast %3 : vector<1x16xf32> to vector<8x16xf32>
    %29 = arith.addf %27, %28 : vector<8x16xf32>
    %30 = arith.truncf %29 : vector<8x16xf32> to vector<8x16xbf16>
    %c0_15 = arith.constant 0 : index
    %c0_16 = arith.constant 0 : index
    %31 = vector.load %arg3[%c0_15, %c0_16] : memref<16x256xbf16, #tpu.memory_space<vmem>>, vector<16x256xbf16>
    %cst_17 = arith.constant dense<0.000000e+00> : vector<8x256xf32>
    %32 = tpu.matmul %30, %31, %cst_17 {dimension_numbers = #tpu.dot_dimension_numbers<[1], [0], [0], [1], [0, 0, 1, 1], [], []>} : vector<8x16xbf16>, vector<16x256xbf16>, vector<8x256xf32> -> vector<8x256xf32>
    %cst_18 = arith.constant dense<0.000000e+00> : vector<256xf32>
    %33 = vector.multi_reduction <add>, %32, %cst_18 [0] : vector<8x256xf32> to vector<256xf32>
    %34 = vector.shape_cast %33 : vector<256xf32> to vector<1x256xf32>
    %cst_19 = arith.constant 8.000000e+00 : f32
    %35 = vector.broadcast %cst_19 : f32 to vector<1x256xf32>
    %36 = arith.divf %34, %35 : vector<1x256xf32>
    %37 = vector.broadcast %36 : vector<1x256xf32> to vector<8x256xf32>
    %38 = arith.subf %32, %37 : vector<8x256xf32>
    %39 = arith.mulf %38, %38 : vector<8x256xf32>
    %cst_20 = arith.constant dense<0.000000e+00> : vector<256xf32>
    %40 = vector.multi_reduction <add>, %39, %cst_20 [0] : vector<8x256xf32> to vector<256xf32>
    %41 = vector.shape_cast %40 : vector<256xf32> to vector<1x256xf32>
    %cst_21 = arith.constant 8.000000e+00 : f32
    %42 = vector.broadcast %cst_21 : f32 to vector<1x256xf32>
    %43 = arith.divf %41, %42 : vector<1x256xf32>
    %cst_22 = arith.constant 9.99999974E-6 : f32
    %44 = vector.broadcast %cst_22 : f32 to vector<1x256xf32>
    %45 = arith.addf %43, %44 : vector<1x256xf32>
    %46 = math.rsqrt %45 : vector<1x256xf32>
    %47 = arith.mulf %4, %46 : vector<1x256xf32>
    %48 = vector.broadcast %36 : vector<1x256xf32> to vector<8x256xf32>
    %49 = arith.subf %32, %48 : vector<8x256xf32>
    %50 = vector.broadcast %47 : vector<1x256xf32> to vector<8x256xf32>
    %51 = arith.mulf %49, %50 : vector<8x256xf32>
    %52 = vector.broadcast %5 : vector<1x256xf32> to vector<8x256xf32>
    %53 = arith.addf %51, %52 : vector<8x256xf32>
    %cst_23 = arith.constant 0.000000e+00 : f32
    %54 = vector.broadcast %cst_23 : f32 to vector<8x256xf32>
    %55 = arith.maximumf %53, %54 : vector<8x256xf32>
    %56 = arith.truncf %55 : vector<8x256xf32> to vector<8x256xbf16>
    %c0_24 = arith.constant 0 : index
    %c0_25 = arith.constant 0 : index
    %57 = vector.load %arg4[%c0_24, %c0_25] : memref<256x128xbf16, #tpu.memory_space<vmem>>, vector<256x128xbf16>
    %cst_26 = arith.constant dense<0.000000e+00> : vector<8x128xf32>
    %58 = tpu.matmul %56, %57, %cst_26 {dimension_numbers = #tpu.dot_dimension_numbers<[1], [0], [0], [1], [0, 0, 1, 1], [], []>} : vector<8x256xbf16>, vector<256x128xbf16>, vector<8x128xf32> -> vector<8x128xf32>
    %59 = vector.broadcast %6 : vector<1x128xf32> to vector<8x128xf32>
    %60 = arith.addf %58, %59 : vector<8x128xf32>
    %61 = vector.extract_strided_slice %1 {offsets = [0, 0], sizes = [8, 1], strides = [1, 1]} : vector<8x4xf32> to vector<8x1xf32>
    %62 = vector.extract_strided_slice %8 {offsets = [0, 0], sizes = [1, 128], strides = [1, 1]} : vector<4x128xf32> to vector<1x128xf32>
    %63 = vector.broadcast %61 : vector<8x1xf32> to vector<8x128xf32>
    %64 = vector.broadcast %62 : vector<1x128xf32> to vector<8x128xf32>
    %65 = arith.mulf %63, %64 : vector<8x128xf32>
    %66 = arith.addf %60, %65 : vector<8x128xf32>
    %67 = vector.extract_strided_slice %1 {offsets = [0, 1], sizes = [8, 1], strides = [1, 1]} : vector<8x4xf32> to vector<8x1xf32>
    %68 = vector.extract_strided_slice %8 {offsets = [1, 0], sizes = [1, 128], strides = [1, 1]} : vector<4x128xf32> to vector<1x128xf32>
    %69 = vector.broadcast %67 : vector<8x1xf32> to vector<8x128xf32>
    %70 = vector.broadcast %68 : vector<1x128xf32> to vector<8x128xf32>
    %71 = arith.mulf %69, %70 : vector<8x128xf32>
    %72 = arith.addf %66, %71 : vector<8x128xf32>
    %73 = vector.extract_strided_slice %1 {offsets = [0, 2], sizes = [8, 1], strides = [1, 1]} : vector<8x4xf32> to vector<8x1xf32>
    %74 = vector.extract_strided_slice %8 {offsets = [2, 0], sizes = [1, 128], strides = [1, 1]} : vector<4x128xf32> to vector<1x128xf32>
    %75 = vector.broadcast %73 : vector<8x1xf32> to vector<8x128xf32>
    %76 = vector.broadcast %74 : vector<1x128xf32> to vector<8x128xf32>
    %77 = arith.mulf %75, %76 : vector<8x128xf32>
    %78 = arith.addf %72, %77 : vector<8x128xf32>
    %79 = vector.extract_strided_slice %1 {offsets = [0, 3], sizes = [8, 1], strides = [1, 1]} : vector<8x4xf32> to vector<8x1xf32>
    %80 = vector.extract_strided_slice %8 {offsets = [3, 0], sizes = [1, 128], strides = [1, 1]} : vector<4x128xf32> to vector<1x128xf32>
    %81 = vector.broadcast %79 : vector<8x1xf32> to vector<8x128xf32>
    %82 = vector.broadcast %80 : vector<1x128xf32> to vector<8x128xf32>
    %83 = arith.mulf %81, %82 : vector<8x128xf32>
    %84 = arith.addf %78, %83 : vector<8x128xf32>
    %cst_27 = arith.constant 0.000000e+00 : f32
    %85 = vector.broadcast %cst_27 : f32 to vector<8x128xf32>
    %86 = arith.maximumf %84, %85 : vector<8x128xf32>
    %87 = arith.truncf %86 : vector<8x128xf32> to vector<8x128xbf16>
    %c0_28 = arith.constant 0 : index
    %c0_29 = arith.constant 0 : index
    %88 = vector.load %arg5[%c0_28, %c0_29] : memref<128x128xbf16, #tpu.memory_space<vmem>>, vector<128x128xbf16>
    %cst_30 = arith.constant dense<0.000000e+00> : vector<8x128xf32>
    %89 = tpu.matmul %87, %88, %cst_30 {dimension_numbers = #tpu.dot_dimension_numbers<[1], [0], [0], [1], [0, 0, 1, 1], [], []>} : vector<8x128xbf16>, vector<128x128xbf16>, vector<8x128xf32> -> vector<8x128xf32>
    %90 = vector.broadcast %7 : vector<1x128xf32> to vector<8x128xf32>
    %91 = arith.addf %89, %90 : vector<8x128xf32>
    %cst_31 = arith.constant dense<0xFF800000> : vector<8xf32>
    %92 = vector.multi_reduction <maximumf>, %91, %cst_31 [1] : vector<8x128xf32> to vector<8xf32>
    %93 = vector.shape_cast %92 : vector<8xf32> to vector<8x1xf32>
    %94 = vector.broadcast %93 : vector<8x1xf32> to vector<8x128xf32>
    %95 = arith.subf %91, %94 : vector<8x128xf32>
    %96 = math.exp %95 : vector<8x128xf32>
    %cst_32 = arith.constant dense<0.000000e+00> : vector<8xf32>
    %97 = vector.multi_reduction <add>, %96, %cst_32 [1] : vector<8x128xf32> to vector<8xf32>
    %98 = vector.shape_cast %97 : vector<8xf32> to vector<8x1xf32>
    %99 = tpu.reciprocal %98 {approx = true} : vector<8x1xf32> -> vector<8x1xf32>
    %100 = vector.broadcast %99 : vector<8x1xf32> to vector<8x128xf32>
    %101 = arith.mulf %96, %100 : vector<8x128xf32>
    %c0_33 = arith.constant 0 : index
    %c0_34 = arith.constant 0 : index
    %102 = vector.load %arg6[%c0_33, %c0_34] : memref<8x128xf32, #tpu.memory_space<vmem>>, vector<8x128xf32>
    tpu.vector_store %arg6[%c0_33, %c0_34], %101 {strides = array<i32>} : memref<8x128xf32, #tpu.memory_space<vmem>>, vector<8x128xf32>,
    return
  }
}

</mosaic_0001>

<bundles_post_ra>
// kernel: critic_forward.1
= control target key start
LH: loop header
LB: loop body
LE: loop exit
PB: predicated region body
PF: predicated region fallthrough
CT: control target
= control target key end

     0   :  { %11 = vsyncpa [#allocation3], 0  ;;  %s944_s0 = inlined_call_operand.vmem [shape: f32[8,16], index: 0, kind: input, shape index: {}]   ;;  %s945_s1 = inlined_call_operand.vmem [shape: f32[8,4], index: 1, kind: input, shape index: {}]   ;;  %s946_s2 = inlined_call_operand.hbm [shape: f32[10,256], index: 2, kind: input, shape index: {}]   ;;  %s947_s3 = inlined_call_operand.hbm [shape: bf16[16,256], index: 3, kind: input, shape index: {}]   ;;  %s948_s4 = inlined_call_operand.hbm [shape: bf16[256,128], index: 4, kind: input, shape index: {}]   ;;  %s949_s5 = inlined_call_operand.hbm [shape: bf16[128,128], index: 5, kind: input, shape index: {}]   ;;  %s950_s6 = inlined_call_operand.hbm [shape: f32[8,128], index: 6, kind: output, shape index: {}]  }
   0x1   :  { %12 = vsyncpa [#allocation6], 0 }
   0x2   :  { %13 = vsyncpa [#allocation9], 0  ;;  %s36_s23 = sshll.u32 %s947_s3, 4  ;;  %s37_s23 = int_to_ptr.hbm [resolvable:$true] %s36_s23 }
   0x3   :  { %14 = vsyncpa [#allocation4], 0  ;;  %s845_s24 = smov [#allocation5]   ;;  %s23_s28 = sshll.u32 %s946_s2, 4  ;;  %s24_s28 = int_to_ptr.hbm [resolvable:$true] %s23_s28 }
   0x4   :  { %s38_s25 = sshll.u32 %s845_s24, 4  ;;  %s846_s29 = smov 128   ;;  %s39_s25 = int_to_ptr.vmem [resolvable:$true] %s38_s25 }
   0x5   :  { %s847_s30 = smov 8   ;;  %s848_s7 = smov [#allocation2]  }
   0x6   :  { %44 = dma.hbm_to_vmem [thread:$0]  %s37_s23, 256, %s39_s25, [#allocation6], %s846_s29, %s846_s29, %s847_s30  }
   0x7   :  { %s25_s8 = sshll.u32 %s848_s7, 4  ;;  %s849_s9 = smov 256   ;;  %s26_s8 = int_to_ptr.vmem [resolvable:$true] %s25_s8 }
   0x8   :  { %s850_s10 = smov 16   ;;  %s49_s12 = sshll.u32 %s948_s4, 4  ;;  %s50_s12 = int_to_ptr.hbm [resolvable:$true] %s49_s12 }
   0x9   :  { %31 = dma.hbm_to_vmem [thread:$0]  %s24_s28, 512, %s26_s8, [#allocation3], %s849_s9, %s849_s9, %s850_s10  }
   0xa   :  { %s851_s13 = smov [#allocation7]   ;;  %s62_s16 = sshll.u32 %s949_s5, 4  ;;  %s63_s16 = int_to_ptr.hbm [resolvable:$true] %s62_s16 }
   0xb   :  { %s51_s14 = sshll.u32 %s851_s13, 4  ;;  %s852_s17 = smov 64   ;;  %s52_s14 = int_to_ptr.vmem [resolvable:$true] %s51_s14 }
   0xc   :  { %s853_s18 = smov 4   ;;  %s854_s19 = smov [#allocation8]  }
   0xd   :  { %57 = dma.hbm_to_vmem [thread:$0]  %s50_s12, 2048, %s52_s14, [#allocation6], %s852_s17, %s852_s17, %s853_s18  }
   0xe   :  { %s64_s20 = sshll.u32 %s854_s19, 4  ;;  %s65_s20 = int_to_ptr.vmem [resolvable:$true] %s64_s20 }
   0xf   :  { %70 = dma.hbm_to_vmem [thread:$0]  %s63_s16, 1024, %s65_s20, [#allocation9], %s852_s17, %s852_s17, %s853_s18  }
  0x10   :  { %837 = dma.done.wait [#allocation3], 512  }
  0x11   :  { %838 = vsyncadd [#allocation3], 4294966784 }
  0x12   :  { %839 = dma.done.wait [#allocation6], 2304  }
  0x13   :  { %840 = vsyncadd [#allocation6], 4294964992 }
  0x14   :  { %841 = dma.done.wait [#allocation9], 1024  }
  0x15   :  { %842 = vsyncadd [#allocation9], 4294966272  ;;  %v855_v0 = vmov 8.0   ;;  %vm100_vm0 = vcmask 130048   ;;  %v554_v2 = vld [vmem:[#allocation5] sm:$0xf] }
  0x16   :  { %705 = vrcp.f32 %v855_v0  ;;  %v659_v3 = vld [vmem:[#allocation5 + $0x4] sm:$0xf0]  ;;  %v88_v4 = vld [vmem:[%s944_s0] sm:$0xff]  ;;  %v556_v29 = vld [vmem:[#allocation5 + $0x8] sm:$0xf0]  ;;  %vm239_vm10 = vcmask 1040384  }
  0x17   :  { %v555_v5 = vor.u32 %v659_v3, %v554_v2  ;;  %v101_v6 = vsel %vm100_vm0, %v88_v4, 0.0  ;;  %v658_v28 = vld [vmem:[#allocation5 + $0x4] sm:$0xf]  ;;  %v90_v38 = vld [vmem:[#allocation2] ss:$0 sm:$0xff]  ;;  %v667_v61 = vld [vmem:[#allocation7 + $0x38] sm:$0xff] }
  0x18   :  { %v102_v8 = vrot.slane %v101_v6, 4  ;;  %v559_v30 = vor.u32 %v658_v28, %v556_v29  ;;  %v91_v42 = vld [vmem:[#allocation2 + $0x1] ss:$0 sm:$0xff]  ;;  %v675_v62 = vld [vmem:[#allocation7 + $0x78] sm:$0xff]  ;;  %389 = vmatpush.bf16.msra.mxu2 %v667_v61  ;;  %v661_v29 = vld [vmem:[#allocation7 + $0x8] sm:$0xff]  ;;  %s540_s25 = sshll.u32 %s950_s6, 4  ;;  %s541_s25 = int_to_ptr.hbm [resolvable:$true] %s540_s25 }
  0x19   :  { %163 = vmatpush.bf16.msra.mxu1 %v555_v5  ;;  %402 = vmatpush.bf16.msra.mxu3 %v675_v62  ;;  %v666_v3 = vld [vmem:[#allocation7 + $0x30] sm:$0xff] }
  0x1a   :  { %v103_v10 = vadd.f32 %v102_v8, %v101_v6  ;;  %v95_v61 = vld [vmem:[#allocation2 + $0x3] ss:$8 sm:$0x3] }
  0x1c   :  { %v706_v1 = vpop.eup %705  ;;  %v104_v12 = vrot.slane %v103_v10, 2  ;;  %390 = vmatpush.bf16.msra.mxu2 %v666_v3  ;;  %v252_v3 = vperm.slane %v95_v61, 1 }
  0x1d   :  { %v109_v7 = vmul.f32 8.0, %v706_v1  ;;  %vm113_vm1 = vweird.f32 %v706_v1  ;;  %176 = vmatpush.bf16.msrb.mxu1 %v559_v30  ;;  %v669_v30 = vld [vmem:[#allocation7 + $0x48] sm:$0xff] }
  0x1e   :  { %v105_v14 = vadd.f32 %v104_v12, %v103_v10  ;;  %v665_v10 = vld [vmem:[#allocation7 + $0x28] sm:$0xff] }
  0x1f   :  { %v110_v9 = vsub.f32 1.0, %v109_v7 }
  0x20   :  { %v106_v15 = vrot.slane %v105_v14, 1  ;;  %391 = vmatpush.bf16.msra.mxu2 %v665_v10 }
  0x21   :  { %v111_v11 = vmul.f32 %v706_v1, %v110_v9 }
  0x22   :  { %v107_v17 = vadd.f32 %v106_v15, %v105_v14  ;;  %v664_v14 = vld [vmem:[#allocation7 + $0x20] sm:$0xff] }
  0x23   :  { %v112_v13 = vadd.f32 %v706_v1, %v111_v11  ;;  %v673_v11 = vld [vmem:[#allocation7 + $0x68] sm:$0xff]  ;;  %v672_v15 = vld [vmem:[#allocation7 + $0x60] sm:$0xff] }
  0x24   :  { %392 = vmatpush.bf16.msra.mxu2 %v664_v14  ;;  %v678_v14 = vld [vmem:[#allocation8 + $0x10] sm:$0xff] }
  0x25   :  { %v912_v16 = vsel %vm113_vm1, %v706_v1, %v112_v13 }
  0x26   :  { %v115_v18 = vmul.f32 %v912_v16, %v107_v17 }
  0x28   :  { %v116_v19 = vsub.f32 %v88_v4, %v115_v18  ;;  %v674_v4 = vld [vmem:[#allocation7 + $0x70] sm:$0xff] }
  0x29   :  { %403 = vmatpush.bf16.msra.mxu3 %v674_v4 }
  0x2a   :  { %v117_v20 = vmul.f32 %v116_v19, %v116_v19 }
  0x2c   :  { %v118_v21 = vsel %vm100_vm0, %v117_v20, 0.0  ;;  %v663_v20 = vld [vmem:[#allocation7 + $0x18] sm:$0xff] }
  0x2d   :  { %v119_v22 = vrot.slane %v118_v21, 4  ;;  %404 = vmatpush.bf16.msra.mxu3 %v673_v11  ;;  %393 = vmatpush.bf16.msra.mxu2 %v663_v20  ;;  %v96_v20 = vld [vmem:[#allocation2 + $0x4] ss:$0 sm:$0xff] }
  0x2f   :  { %v120_v23 = vadd.f32 %v119_v22, %v118_v21  ;;  %v671_v21 = vld [vmem:[#allocation7 + $0x58] sm:$0xff] }
  0x31   :  { %v121_v24 = vrot.slane %v120_v23, 2  ;;  %405 = vmatpush.bf16.msra.mxu3 %v672_v15  ;;  %v677_v15 = vld [vmem:[#allocation8 + $0x8] sm:$0xff] }
  0x33   :  { %v122_v25 = vadd.f32 %v121_v24, %v120_v23 }
  0x35   :  { %v123_v26 = vrot.slane %v122_v25, 1  ;;  %406 = vmatpush.bf16.msra.mxu3 %v671_v21 }
  0x37   :  { %v124_v27 = vadd.f32 %v123_v26, %v122_v25  ;;  %v662_v25 = vld [vmem:[#allocation7 + $0x10] sm:$0xff] }
  0x38   :  { %v670_v26 = vld [vmem:[#allocation7 + $0x50] sm:$0xff]  ;;  %394 = vmatpush.bf16.msra.mxu2 %v662_v25 }
  0x39   :  { %v125_v31 = vmul.f32 %v124_v27, %v912_v16  ;;  %407 = vmatpush.bf16.msra.mxu3 %v670_v26 }
  0x3b   :  { %v126_v32 = vadd.f32 1e-05, %v125_v31 }
  0x3c   :  { %395 = vmatpush.bf16.msra.mxu2 %v661_v29 }
  0x3d   :  { %707 = vrsqrt.f32 %v126_v32  ;;  %vm133_vm2 = vweird.f32 %v126_v32  ;;  %408 = vmatpush.bf16.msra.mxu3 %v669_v30 }
  0x43   :  { %v708_v33 = vpop.eup %707 }
  0x44   :  { %v128_v34 = vmul.f32 %v708_v33, %v126_v32  ;;  %vm134_vm3 = vweird.f32 %v708_v33 }
  0x45   :  { %vm135_vm4 = vmor %vm133_vm2, %vm134_vm3 }
  0x46   :  { %v129_v35 = vmul.f32 %v708_v33, %v128_v34  ;;  %v668_v34 = vld [vmem:[#allocation7 + $0x40] sm:$0xff] }
  0x47   :  { %409 = vmatpush.bf16.msra.mxu3 %v668_v34 }
  0x48   :  { %v130_v36 = vmul.f32 0.5, %v129_v35 }
  0x4a   :  { %v131_v37 = vsub.f32 1.5, %v130_v36 }
  0x4c   :  { %v132_v39 = vmul.f32 %v708_v33, %v131_v37 }
  0x4e   :  { %v136_v40 = vsel %vm135_vm4, %v708_v33, %v132_v39  ;;  %v660_v33 = vld [vmem:[#allocation7] sm:$0xff]  ;;  %v89_v39 = vld [vmem:[%s945_s1] sm:$0xff]  ;;  %s860_s1 = smov [#allocation10]  }
  0x4f   :  { %v137_v41 = vmul.f32 %v136_v40, %v90_v38  ;;  %396 = vmatpush.bf16.msra.mxu2 %v660_v33  ;;  %v683_v40 = vld [vmem:[#allocation8 + $0x38] sm:$0xff]  ;;  %s538_s22 = sshll.u32 %s860_s1, 4  ;;  %s539_s22 = int_to_ptr.vmem [resolvable:$true] %s538_s22 }
  0x50   :  { %510 = vmatpush.bf16.msra.mxu0 %v683_v40 }
  0x51   :  { %v138_v43 = vmul.f32 %v137_v41, %v116_v19  ;;  %v856_v41 = vmov 0  }
  0x52   :  { %700 = vset.pattern.permute.xlu0 %v856_v41 }
  0x53   :  { %v139_v44 = vadd.f32 %v138_v43, %v91_v42  ;;  %v857_v42 = vmov 2   ;;  %417 = vperm.xlu0 %700, %v89_v39  }
  0x54   :  { %702 = vset.pattern.permute.xlu1 %v857_v42 }
  0x55   :  { %v140_v45 = vpack.c.bf16 %v139_v44, %v139_v44  ;;  %431 = vperm.xlu1 %702, %v89_v39  }
  0x57   :  { %560 = vmatmul.msk.bf16.vlgmr.msra.gmra.mxu1 %vm100_vm0, %v140_v45 }
  0x67   :  { %561 = vmatmul.msk.bf16.vlgmr.msrb.gmra.mxu1 %vm100_vm0, %v140_v45 }
  0xd4   :  { %v165_v46 = vpop.f32.mrf.mxu1 }
  0xd5   :  { %v182_v47 = vrot.slane %v165_v46, 4 }
  0xd7   :  { %v183_v48 = vadd.f32 %v182_v47, %v165_v46 }
  0xd9   :  { %v184_v49 = vrot.slane %v183_v48, 2 }
  0xdb   :  { %v185_v50 = vadd.f32 %v184_v49, %v183_v48  ;;  %v681_v48 = vld [vmem:[#allocation8 + $0x28] sm:$0xff] }
  0xdc   :  { %v167_v51 = vpop.f32.mrf.mxu1 }
  0xdd   :  { %v186_v52 = vrot.slane %v185_v50, 1  ;;  %v858_v51 = vmov 1  }
  0xde   :  { %701 = vset.pattern.permute.xlu0 %v858_v51 }
  0xdf   :  { %v187_v53 = vadd.f32 %v186_v52, %v185_v50  ;;  %v859_v52 = vmov 3   ;;  %424 = vperm.xlu0 %701, %v89_v39  }
  0xe0   :  { %703 = vset.pattern.permute.xlu1 %v859_v52 }
  0xe1   :  { %v194_v54 = vmul.f32 %v187_v53, %v912_v16  ;;  %438 = vperm.xlu1 %703, %v89_v39  }
  0xe3   :  { %v920_v55 = vsub.f32 %v165_v46, %v194_v54 }
  0xe4   :  { %v178_v56 = vpop.f32.mrf.mxu1 }
  0xe5   :  { %v198_v57 = vmul.f32 %v920_v55, %v920_v55  ;;  %v188_v58 = vrot.slane %v178_v56, 4 }
  0xe7   :  { %v200_v59 = vrot.slane %v198_v57, 4  ;;  %v189_v60 = vadd.f32 %v188_v58, %v178_v56  ;;  %v93_v58 = vld [vmem:[#allocation2 + $0x2] ss:$8 sm:$0x3]  ;;  %704 = vset.pattern.permute.xlu0 %v859_v52 }
  0xe9   :  { %v201_v63 = vadd.f32 %v200_v59, %v198_v57  ;;  %v190_v0 = vrot.slane %v189_v60, 2 }
  0xeb   :  { %v202_v1 = vrot.slane %v201_v63, 2  ;;  %v191_v2 = vadd.f32 %v190_v0, %v189_v60 }
  0xec   :  { %v180_v5 = vpop.f32.mrf.mxu1 }
  0xed   :  { %v203_v6 = vadd.f32 %v202_v1, %v201_v63  ;;  %v192_v7 = vrot.slane %v191_v2, 1  ;;  %v251_v1 = vperm.slane %v95_v61, 0 }
  0xef   :  { %v204_v8 = vrot.slane %v203_v6, 1  ;;  %v193_v9 = vadd.f32 %v192_v7, %v191_v2 }
  0xf1   :  { %v205_v12 = vadd.f32 %v204_v8, %v203_v6  ;;  %v195_v13 = vmul.f32 %v193_v9, %v912_v16 }
  0xf3   :  { %v925_v17 = vsub.f32 %v178_v56, %v195_v13  ;;  %v212_v18 = vmul.f32 %v205_v12, %v912_v16  ;;  %v680_v12 = vld [vmem:[#allocation8 + $0x20] sm:$0xff]  ;;  %v679_v13 = vld [vmem:[#allocation8 + $0x18] sm:$0xff] }
  0xf5   :  { %v199_v19 = vmul.f32 %v925_v17, %v925_v17  ;;  %v930_v23 = vadd.f32 1e-05, %v212_v18  ;;  %v676_v18 = vld [vmem:[#allocation8] sm:$0xff] }
  0xf7   :  { %v206_v22 = vrot.slane %v199_v19, 4  ;;  %709 = vrsqrt.f32 %v930_v23  ;;  %vm222_vm9 = vweird.f32 %v930_v23 }
  0xf9   :  { %v207_v24 = vadd.f32 %v206_v22, %v199_v19  ;;  %v98_v19 = vld [vmem:[#allocation2] sm:$0xc0]  ;;  %v99_v22 = vld [vmem:[#allocation2 + $0x10] sm:$0x3] }
  0xfa   :  { %v420_v21 = vperm.slane %v98_v19, 6 }
  0xfb   :  { %v208_v27 = vrot.slane %v207_v24, 2 }
  0xfd   :  { %v209_v28 = vadd.f32 %v208_v27, %v207_v24  ;;  %v710_v35 = vpop.eup %709 }
  0xfe   :  { %v217_v38 = vmul.f32 %v710_v35, %v930_v23  ;;  %vm223_vm6 = vweird.f32 %v710_v35  ;;  %v427_v23 = vperm.slane %v98_v19, 7 }
  0xff   :  { %v210_v31 = vrot.slane %v209_v28, 1  ;;  %vm224_vm11 = vmor %vm222_vm9, %vm223_vm6 }
 0x100   :  { %v218_v43 = vmul.f32 %v710_v35, %v217_v38 }
 0x101   :  { %v211_v32 = vadd.f32 %v210_v31, %v209_v28  ;;  %v434_v28 = vperm.slane %v99_v22, 0 }
 0x102   :  { %v219_v46 = vmul.f32 0.5, %v218_v43 }
 0x103   :  { %v213_v36 = vmul.f32 %v211_v32, %v912_v16  ;;  %v682_v16 = vld [vmem:[#allocation8 + $0x30] sm:$0xff]  ;;  %v441_v32 = vperm.slane %v99_v22, 1 }
 0x104   :  { %511 = vmatpush.bf16.msra.mxu0 %v682_v16  ;;  %v220_v50 = vsub.f32 1.5, %v219_v46  ;;  %v97_v16 = vld [vmem:[#allocation2 + $0x5] ss:$0 sm:$0xff] }
 0x105   :  { %v215_v37 = vadd.f32 1e-05, %v213_v36 }
 0x106   :  { %v221_v54 = vmul.f32 %v710_v35, %v220_v50 }
 0x107   :  { %711 = vrsqrt.f32 %v215_v37  ;;  %vm232_vm7 = vweird.f32 %v215_v37 }
 0x108   :  { %512 = vmatpush.bf16.msra.mxu0 %v681_v48  ;;  %v225_v60 = vsel %vm224_vm11, %v710_v35, %v221_v54 }
 0x10c   :  { %513 = vmatpush.bf16.msra.mxu0 %v680_v12 }
 0x10d   :  { %v712_v44 = vpop.eup %711 }
 0x10e   :  { %v227_v45 = vmul.f32 %v712_v44, %v215_v37  ;;  %vm233_vm5 = vweird.f32 %v712_v44 }
 0x10f   :  { %vm234_vm8 = vmor %vm232_vm7, %vm233_vm5 }
 0x110   :  { %v228_v47 = vmul.f32 %v712_v44, %v227_v45  ;;  %514 = vmatpush.bf16.msra.mxu0 %v679_v13 }
 0x112   :  { %v229_v49 = vmul.f32 0.5, %v228_v47 }
 0x114   :  { %v230_v53 = vsub.f32 1.5, %v229_v49  ;;  %515 = vmatpush.bf16.msra.mxu0 %v678_v14 }
 0x116   :  { %v231_v56 = vmul.f32 %v712_v44, %v230_v53 }
 0x118   :  { %v235_v57 = vsel %vm234_vm8, %v712_v44, %v231_v56  ;;  %516 = vmatpush.bf16.msra.mxu0 %v677_v15 }
 0x119   :  { %v238_v59 = vrot.slane %v235_v57, 7 }
 0x11b   :  { %v240_v62 = vsel %vm239_vm10, %v225_v60, %v238_v59 }
 0x11c   :  { %v242_v63 = vmul.f32 %v240_v62, %v93_v58  ;;  %517 = vmatpush.bf16.msra.mxu0 %v676_v18 }
 0x11e   :  { %v244_v0 = vperm.slane %v242_v63, 0  ;;  %v245_v2 = vperm.slane %v242_v63, 1 }
 0x120   :  { %v248_v4 = vmul.f32 %v244_v0, %v920_v55  ;;  %v249_v5 = vmul.f32 %v245_v2, %v925_v17  ;;  %v418_v55 = vpop.permute.xlu0 %417  ;;  %v432_v17 = vpop.permute.xlu1 %431 }
 0x121   :  { %v421_v29 = vmul.f32 %v420_v21, %v418_v55  ;;  %v435_v35 = vmul.f32 %v434_v28, %v432_v17 }
 0x122   :  { %v255_v6 = vadd.f32 %v251_v1, %v248_v4  ;;  %v256_v7 = vadd.f32 %v252_v3, %v249_v5 }
 0x124   :  { %v257_v8 = vmax.f32 %v255_v6, 0.0  ;;  %v258_v9 = vmax.f32 %v256_v7, 0.0 }
 0x126   :  { %v259_v10 = vpack.c.bf16 %v257_v8, %v257_v8  ;;  %v260_v11 = vpack.c.bf16 %v258_v9, %v258_v9 }
 0x128   :  { %397 = vmatmul.bf16.vlgmr.msra.gmra.mxu2 %v259_v10  ;;  %410 = vmatmul.bf16.vlgmr.msra.gmra.mxu3 %v260_v11 }
 0x151   :  { %v425_v24 = vpop.permute.xlu0 %424 }
 0x152   :  { %v428_v31 = vmul.f32 %v427_v23, %v425_v24 }
 0x153   :  { %v439_v33 = vpop.permute.xlu1 %438 }
 0x154   :  { %v442_v37 = vmul.f32 %v441_v32, %v439_v33 }
 0x1ab   :  { %v398_v25 = vpop.f32.mrf.mxu2  ;;  %v411_v26 = vpop.f32.mrf.mxu3 }
 0x1ac   :  { %v399_v27 = vadd.f32 %v398_v25, %v96_v20 }
 0x1ae   :  { %v412_v30 = vadd.f32 %v411_v26, %v399_v27 }
 0x1b0   :  { %v422_v34 = vadd.f32 %v421_v29, %v412_v30 }
 0x1b2   :  { %v429_v36 = vadd.f32 %v428_v31, %v422_v34 }
 0x1b3   :  { %v400_v38 = vpop.f32.mrf.mxu2  ;;  %v413_v39 = vpop.f32.mrf.mxu3 }
 0x1b4   :  { %v436_v40 = vadd.f32 %v435_v35, %v429_v36 }
 0x1b6   :  { %v443_v41 = vadd.f32 %v442_v37, %v436_v40 }
 0x1b8   :  { %v444_v42 = vmax.f32 %v443_v41, 0.0 }
 0x1ba   :  { %v445_v43 = vpack.c.bf16 %v444_v42, %v444_v42 }
 0x1bc   :  { %518 = vmatmul.bf16.vlgmr.msra.gmra.mxu0 %v445_v43 }
 0x239   :  { %v519_v44 = vpop.f32.mrf.mxu0 }
 0x23a   :  { %v520_v45 = vadd.f32 %v519_v44, %v97_v16 }
 0x23c   :  { %523 = vmax.xlane.f32.xlu2 %v520_v45 }
 0x241   :  { %v521_v46 = vpop.f32.mrf.mxu0 }
 0x2af   :  { %v524_v47 = vpop.xlane.xlu2 %523 }
 0x2b0   :  { %v525_v48 = vsub.f32 %v520_v45, %v524_v47 }
 0x2b2   :  { %v526_v49 = vmul.f32 1.442695, %v525_v48 }
 0x2b4   :  { %713 = vpow2.f32 %v526_v49 }
 0x2ba   :  { %v714_v50 = vpop.eup %713 }
 0x2bb   :  { %528 = vadd.xlane.f32.xlu2 %v714_v50 }
 0x32e   :  { %v529_v51 = vpop.xlane.xlu2 %528 }
 0x32f   :  { %715 = vrcp.f32 %v529_v51 }
 0x335   :  { %v716_v52 = vpop.eup %715 }
 0x336   :  { %v531_v53 = vmul.f32 %v716_v52, %v714_v50 }
 0x338   :  { %532 = vst [vmem:[#allocation10] sm:$0xff] %v531_v53 }
 0x339   :  { %543 = dma.vmem_to_hbm [thread:$0]  %s539_s22, 128, %s541_s25, [#allocation4]  }
 0x33a   :  { %843 = dma.done.wait [#allocation4], 128  }
 0x33b   :  { %844 = vsyncadd [#allocation4], 4294967168 }
 0x33c   :  { %548 = vsyncpa [#allocation3], 1 }
 0x33d   :  { %549 = vsyncpa [#allocation6], 1 }
 0x33e   :  { %550 = vsyncpa [#allocation9], 1 }
 0x33f   :  { %551 = vsyncpa [#allocation4], 1 }

</bundles_post_ra>
